<compile_context>
chip_gen: v5e
topology: v5e:2x2
jax: 0.10.0
libtpu: 0.0.40
codegen_flags: <defaults>
</compile_context>

<pallas_src>
import jax
import jax.numpy as jnp
from jax import lax
from jax.experimental import pallas as pl
from jax.experimental.pallas import tpu as pltpu


# ------------------------------ chip tuning --------------------------------- #

_VMEM_LIMIT_CACHE = None


def _vmem_limit():
    """~3/4 of physical VMEM, capped at 96 MiB (v5e/v6e: 96 MiB, v7x: 48 MiB)."""
    global _VMEM_LIMIT_CACHE
    if _VMEM_LIMIT_CACHE is None:
        try:
            cap = pltpu.get_tpu_info().vmem_capacity_bytes
            _VMEM_LIMIT_CACHE = int(min(cap * 3 // 4, 96 * 1024 * 1024))
        except Exception:
            _VMEM_LIMIT_CACHE = 32 * 1024 * 1024
    return _VMEM_LIMIT_CACHE


def _linear_tile_targets():
    # Grow linear tiles when the VMEM budget allows it (v5e/v6e); stay
    # conservative on v7x (64 MiB physical VMEM).
    if _vmem_limit() >= 64 * 1024 * 1024:
        return 512, 512, 512
    return 256, 256, 512


def _pick_tile(dim, target, align):
    """Largest tile <= target that divides `dim` and is a multiple of `align`.

    Falls back to the full dimension (always a legal block) if no aligned
    divisor exists.  TODO(synk): pad the operand instead of the full-dim
    fallback for pathological (prime-ish) dims.
    """
    if dim <= target:
        return dim
    t = (target // align) * align
    while t >= align:
        if dim % t == 0:
            return t
        t -= align
    return dim


def _pick_head_group(num_heads, head_dim):
    """Smallest head-group size G (dividing H) with G*Dh a multiple of 128.

    Returns 1 when Dh is already 128-aligned (clean per-head 2-D matmuls on
    aligned slices) and also when no aligned grouping exists (tiny head dims),
    in which case the per-head path is the simplest correct choice.
    """
    if (head_dim % 128) == 0:
        return 1
    for g in range(2, num_heads + 1):
        if num_heads % g == 0 and (g * head_dim) % 128 == 0:
            return g
    return 1


# ----------------------------- tiled linear -------------------------------- #

def _linear_kernel(x_ref, w_ref, b_ref, o_ref, acc_ref):
    k = pl.program_id(2)

    @pl.when(k == 0)
    def _init():
        acc_ref[...] = jnp.zeros_like(acc_ref)

    # bf16 MXU operands, f32 accumulation.
    acc_ref[...] += jnp.dot(x_ref[...].astype(jnp.bfloat16),
                            w_ref[...].astype(jnp.bfloat16),
                            preferred_element_type=jnp.float32)

    @pl.when(k == pl.num_programs(2) - 1)
    def _finish():
        o_ref[...] = (acc_ref[...] + b_ref[...]).astype(o_ref.dtype)


def pallas_linear(x, w_t, b, *, out_dtype=jnp.float32):
    """y = x @ w_t + b  with x:(M,K), w_t:(K,N) (bf16), b:(N,) f32."""
    M, K = x.shape
    N = w_t.shape[1]
    tm_t, tn_t, tk_t = _linear_tile_targets()
    tm = _pick_tile(M, tm_t, 8)
    tn = _pick_tile(N, tn_t, 128)
    tk = _pick_tile(K, tk_t, 128)
    b2 = b.reshape(1, N).astype(jnp.float32)
    return pl.pallas_call(
        _linear_kernel,
        out_shape=jax.ShapeDtypeStruct((M, N), out_dtype),
        grid=(M // tm, N // tn, K // tk),
        in_specs=[
            pl.BlockSpec((tm, tk), lambda i, j, k: (i, k)),
            pl.BlockSpec((tk, tn), lambda i, j, k: (k, j)),
            pl.BlockSpec((1, tn), lambda i, j, k: (0, j)),
        ],
        out_specs=pl.BlockSpec((tm, tn), lambda i, j, k: (i, j)),
        scratch_shapes=[pltpu.VMEM((tm, tn), jnp.float32)],
        compiler_params=pltpu.CompilerParams(
            dimension_semantics=("parallel", "parallel", "arbitrary"),
            vmem_limit_bytes=_vmem_limit(),
        ),
    )(x, w_t, b2)


# ----------------------------- attention kernel ----------------------------- #

def _softmax_lastdim(s):
    m = jnp.max(s, axis=-1, keepdims=True)
    e = jnp.exp(s - m)
    # approx reciprocal runs on the EUP slot (idle alongside exp); exact would
    # burn VALU slots.
    return e * pl.reciprocal(jnp.sum(e, axis=-1, keepdims=True), approx=True)


def _make_attn_kernel(num_heads, head_dim, group_size, with_weights):
    E = num_heads * head_dim
    G = group_size
    GD = G * head_dim
    n_groups = num_heads // G
    inv_h = 1.0 / num_heads

    def kernel(q_ref, kv_ref, o_ref, *rest):
        q_all = q_ref[0]                     # (tT, E)  bf16, q pre-scaled
        kv = kv_ref[0]                       # (S, 2E)  bf16, [k | v] columns
        tT = q_all.shape[0]
        S = kv.shape[0]
        # Short static loop over head groups.  Each group's result goes
        # straight into o_ref / w_ref so nothing accumulates in vregs across
        # iterations (no head_outs list, no final concatenate).
        for g in range(n_groups):
            c0 = g * GD
            q_g = q_all[:, c0:c0 + GD]                   # (tT, GD)
            k_g = kv[:, c0:c0 + GD]                      # (S,  GD)
            v_g = kv[:, E + c0:E + c0 + GD]              # (S,  GD)
            if G == 1:
                # Per-head 2-D MXU matmuls (GD == head_dim).
                s = lax.dot_general(q_g, k_g, (((1,), (1,)), ((), ())),
                                    preferred_element_type=jnp.float32)  # (tT,S)
                p = _softmax_lastdim(s)
                o_g = jnp.dot(p.astype(v_g.dtype), v_g,
                              preferred_element_type=jnp.float32)        # (tT,Dh)
                p_sum = p
            else:
                # 128-lane-aligned group: batched matmuls over the G heads.
                q_b = jnp.transpose(q_g.reshape(tT, G, head_dim), (1, 0, 2))
                k_b = jnp.transpose(k_g.reshape(S, G, head_dim), (1, 0, 2))
                v_b = jnp.transpose(v_g.reshape(S, G, head_dim), (1, 0, 2))
                s = jnp.einsum('gqd,gkd->gqk', q_b, k_b,
                               preferred_element_type=jnp.float32)       # (G,tT,S)
                p = _softmax_lastdim(s)
                o_b = jnp.einsum('gqk,gkd->gqd', p.astype(v_b.dtype), v_b,
                                 preferred_element_type=jnp.float32)     # (G,tT,Dh)
                o_g = jnp.transpose(o_b, (1, 0, 2)).reshape(tT, GD)
                p_sum = jnp.sum(p, axis=0)                               # (tT,S)
            # Direct per-group store (128-aligned column offset when G > 1).
            o_ref[0, :, c0:c0 + GD] = o_g.astype(o_ref.dtype)
            if with_weights:
                w_ref = rest[0]
                contrib = p_sum * inv_h
                if g == 0:
                    w_ref[0] = contrib
                else:
                    w_ref[0] += contrib

    return kernel


def pallas_attention(q, kv, num_heads, *, need_weights, tgt_tile_target=128):
    """q: (B, T, E) pre-scaled queries, kv: (B, S, 2E) fused [k|v].  S == T.

    Returns (attn_out (B, T, E) bf16, head-averaged weights (B, T, S) f32 or
    None).
    """
    B, T, E = q.shape
    S = kv.shape[1]
    head_dim = E // num_heads
    G = _pick_head_group(num_heads, head_dim)
    tT = _pick_tile(T, tgt_tile_target, 8)
    kernel = _make_attn_kernel(num_heads, head_dim, G, need_weights)

    grid = (B, T // tT)
    in_specs = [
        pl.BlockSpec((1, tT, E), lambda b, i: (b, i, 0)),       # q: T-tiled
        pl.BlockSpec((1, S, 2 * E), lambda b, i: (b, 0, 0)),    # kv: per batch
    ]
    out_spec_o = pl.BlockSpec((1, tT, E), lambda b, i: (b, i, 0))
    cparams = pltpu.CompilerParams(
        dimension_semantics=("parallel", "parallel"),
        vmem_limit_bytes=_vmem_limit(),
    )
    if need_weights:
        out, w = pl.pallas_call(
            kernel,
            out_shape=(jax.ShapeDtypeStruct((B, T, E), jnp.bfloat16),
                       jax.ShapeDtypeStruct((B, T, S), jnp.float32)),
            grid=grid,
            in_specs=in_specs,
            out_specs=(out_spec_o,
                       pl.BlockSpec((1, tT, S), lambda b, i: (b, i, 0))),
            compiler_params=cparams,
        )(q, kv)
        return out, w
    out = pl.pallas_call(
        kernel,
        out_shape=jax.ShapeDtypeStruct((B, T, E), jnp.bfloat16),
        grid=grid,
        in_specs=in_specs,
        out_specs=out_spec_o,
        compiler_params=cparams,
    )(q, kv)
    return out, None


# ------------------------------ Module wrapper ------------------------------ #

class MultiheadAttentionPallas:
    def __init__(self, embed_dim, num_heads, key, dropout=0.0, bias=True):
        assert embed_dim % num_heads == 0
        self.embed_dim = embed_dim
        self.num_heads = num_heads
        self.head_dim = embed_dim // num_heads
        self.attn_embed_dim = embed_dim
        self.dropout = dropout

        k1, k2, k3, k4 = jax.random.split(key, 4)

        def xavier(k, shape):
            fan_out, fan_in = shape
            bound = (6.0 / (fan_in + fan_out)) ** 0.5
            return jax.random.uniform(k, shape, jnp.float32, -bound, bound)

        # f32 "master" parameters (same init scheme as the torch module).
        self.in_proj_weight = xavier(k1, (3 * embed_dim, embed_dim))   # (3E, E)
        self.out_proj_weight = xavier(k2, (embed_dim, embed_dim))      # (E, E)
        bb = 1.0 / (embed_dim ** 0.5)
        self.in_proj_bias = jax.random.uniform(k3, (3 * embed_dim,), jnp.float32, -bb, bb)
        self.out_proj_bias = jax.random.uniform(k4, (embed_dim,), jnp.float32, -bb, bb)

        # Pallas-path parameters: pre-transposed, bf16 for the MXU, with the
        # 1/sqrt(head_dim) scaling folded into the q projection (zero runtime
        # cost, mathematically identical to the reference's q = q * scaling).
        E = embed_dim
        scaling = float(self.head_dim) ** (-0.5)
        w_in_t = jnp.transpose(self.in_proj_weight)                    # (E, 3E)
        self._w_q_t = (w_in_t[:, :E] * scaling).astype(jnp.bfloat16)   # (E, E)
        self._w_kv_t = w_in_t[:, E:].astype(jnp.bfloat16)              # (E, 2E)
        self._b_q = self.in_proj_bias[:E] * scaling
        self._b_kv = self.in_proj_bias[E:]
        self._w_out_t = jnp.transpose(self.out_proj_weight).astype(jnp.bfloat16)

    def __call__(self, query, key, value, need_weights=True):
        # query/key/value: (tgt_len, bsz, embed_dim) -- Time x Batch x Channel.
        T, B, E = query.shape
        assert key.shape == value.shape
        H = self.num_heads

        # Internal batch-major layout so the attention BlockSpecs keep their
        # last two dims full / lane-dense.
        x_bm = jnp.transpose(query, (1, 0, 2)).reshape(B * T, E)

        # Separate q / kv projections (q rows already carry the scaling);
        # intermediates are emitted in bf16 to halve HBM traffic.
        q = pallas_linear(x_bm, self._w_q_t, self._b_q,
                          out_dtype=jnp.bfloat16).reshape(B, T, E)
        kv = pallas_linear(x_bm, self._w_kv_t, self._b_kv,
                           out_dtype=jnp.bfloat16).reshape(B, T, 2 * E)

        attn, avg_w = pallas_attention(q, kv, H, need_weights=need_weights)

        out = pallas_linear(attn.reshape(B * T, E), self._w_out_t,
                            self.out_proj_bias,
                            out_dtype=jnp.float32).reshape(B, T, E)
        out = jnp.transpose(out, (1, 0, 2))     # back to (T, B, E)
        return out, avg_w


# -------------------------------- reference --------------------------------- #

def reference_forward(mod, query):
    T, B, E = query.shape
    H, Dh = mod.num_heads, mod.head_dim
    scaling = float(Dh) ** (-0.5)
    acti = query @ mod.in_proj_weight.T + mod.in_proj_bias
    q, k, v = jnp.split(acti, 3, axis=-1)
    q = q * scaling
    qh = q.reshape(T, B * H, Dh).transpose(1, 0, 2)
    kh = k.reshape(T, B * H, Dh).transpose(1, 0, 2)
    vh = v.reshape(T, B * H, Dh).transpose(1, 0, 2)
    s = jnp.einsum("btd,bsd->bts", qh, kh)
    p = jax.nn.softmax(s, axis=-1)
    o = jnp.einsum("bts,bsd->btd", p, vh)
    o = o.transpose(1, 0, 2).reshape(T, B, E)
    o = o @ mod.out_proj_weight.T + mod.out_proj_bias
    w = p.reshape(B, H, T, -1).sum(axis=1) / H
    return o, w


# ---------------------------------- main ------------------------------------ #

if __name__ == "__main__":
    T, B, E, H = 8, 2, 32, 4  # tgt_len, batch, embed_dim, num_heads

    root = jax.random.PRNGKey(0)
    k_param, k_q = jax.random.split(root)

    mha = MultiheadAttentionPallas(E, H, k_param, dropout=0.0, bias=True)

    # Time x Batch x Channel inputs (self-attention: key/value only size-checked)
    query = jax.random.normal(k_q, (T, B, E), jnp.float32)
    key = query
    value = query

    out, attn_weights = mha(query, key, value, need_weights=True)
    out = jax.block_until_ready(out)
    attn_weights = jax.block_until_ready(attn_weights)

    ref_out, ref_w = reference_forward(mha, query)
    assert out.shape == (T, B, E)
    assert attn_weights.shape == (B, T, T)
    # bf16 MXU operands with f32 accumulation -> slightly looser tolerances.
    assert jnp.allclose(out, ref_out, atol=2e-2, rtol=2e-2)
    assert jnp.allclose(attn_weights, ref_w, atol=1e-2, rtol=1e-2)

    # need_weights=False path (no weights ever stored to HBM).
    out2, w2 = mha(query, key, value, need_weights=False)
    out2 = jax.block_until_ready(out2)
    assert w2 is None
    assert jnp.allclose(out2, ref_out, atol=2e-2, rtol=2e-2)

    print("KERNEL_OK")
</pallas_src>

<mosaic_0001>
module attributes {stable_mosaic.version = 11 : i64} {
  func.func @_linear_kernel(%arg0: i32, %arg1: i32, %arg2: i32, %arg3: memref<16x32xf32, #tpu.memory_space<vmem>>, %arg4: memref<32x32xbf16, #tpu.memory_space<vmem>>, %arg5: memref<1x32xf32, #tpu.memory_space<vmem>>, %arg6: memref<16x32xbf16, #tpu.memory_space<vmem>>, %arg7: memref<16x32xf32, #tpu.memory_space<vmem>>) attributes {dimension_semantics = [#tpu.dimension_semantics<parallel>, #tpu.dimension_semantics<parallel>, #tpu.dimension_semantics<arbitrary>], iteration_bounds = array<i64: 1, 1, 1>, scalar_prefetch = 0 : i64, scratch_operands = 1 : i64, tpu.core_type = #tpu.core_type<tc>, window_params = [{transform_indices = @transform_0, window_bounds = array<i64: 16, 32>}, {transform_indices = @transform_1, window_bounds = array<i64: 32, 32>}, {transform_indices = @transform_2, window_bounds = array<i64: 1, 32>}, {transform_indices = @transform_3, window_bounds = array<i64: 16, 32>}]} {
    %c0_i32 = arith.constant 0 : i32
    %0 = arith.cmpi eq, %arg2, %c0_i32 : i32
    %1 = arith.extui %0 : i1 to i32
    %c0_i32_0 = arith.constant 0 : i32
    %2 = arith.cmpi ne, %1, %c0_i32_0 : i32
    scf.if %2 {
      %cst_10 = arith.constant 0.000000e+00 : f32
      %13 = vector.broadcast %cst_10 : f32 to vector<16x32xf32>
      %c0_11 = arith.constant 0 : index
      %c0_12 = arith.constant 0 : index
      %14 = vector.load %arg7[%c0_11, %c0_12] : memref<16x32xf32, #tpu.memory_space<vmem>>, vector<16x32xf32>
      tpu.vector_store %arg7[%c0_11, %c0_12], %13 {strides = array<i32>} : memref<16x32xf32, #tpu.memory_space<vmem>>, vector<16x32xf32>,
    } else {
    }
    %c0 = arith.constant 0 : index
    %c0_1 = arith.constant 0 : index
    %3 = vector.load %arg7[%c0, %c0_1] : memref<16x32xf32, #tpu.memory_space<vmem>>, vector<16x32xf32>
    %c0_2 = arith.constant 0 : index
    %c0_3 = arith.constant 0 : index
    %4 = vector.load %arg3[%c0_2, %c0_3] : memref<16x32xf32, #tpu.memory_space<vmem>>, vector<16x32xf32>
    %5 = arith.truncf %4 : vector<16x32xf32> to vector<16x32xbf16>
    %c0_4 = arith.constant 0 : index
    %c0_5 = arith.constant 0 : index
    %6 = vector.load %arg4[%c0_4, %c0_5] : memref<32x32xbf16, #tpu.memory_space<vmem>>, vector<32x32xbf16>
    %cst = arith.constant dense<0.000000e+00> : vector<16x32xf32>
    %7 = tpu.matmul %5, %6, %cst {dimension_numbers = #tpu.dot_dimension_numbers<[1], [0], [0], [1], [0, 0, 1, 1], [], []>} : vector<16x32xbf16>, vector<32x32xbf16>, vector<16x32xf32> -> vector<16x32xf32>
    %8 = arith.addf %3, %7 : vector<16x32xf32>
    %c0_6 = arith.constant 0 : index
    %c0_7 = arith.constant 0 : index
    %9 = vector.load %arg7[%c0_6, %c0_7] : memref<16x32xf32, #tpu.memory_space<vmem>>, vector<16x32xf32>
    tpu.vector_store %arg7[%c0_6, %c0_7], %8 {strides = array<i32>} : memref<16x32xf32, #tpu.memory_space<vmem>>, vector<16x32xf32>,
    %c0_i32_8 = arith.constant 0 : i32
    %10 = arith.cmpi eq, %arg2, %c0_i32_8 : i32
    %11 = arith.extui %10 : i1 to i32
    %c0_i32_9 = arith.constant 0 : i32
    %12 = arith.cmpi ne, %11, %c0_i32_9 : i32
    scf.if %12 {
      %c0_10 = arith.constant 0 : index
      %c0_11 = arith.constant 0 : index
      %13 = vector.load %arg7[%c0_10, %c0_11] : memref<16x32xf32, #tpu.memory_space<vmem>>, vector<16x32xf32>
      %c0_12 = arith.constant 0 : index
      %c0_13 = arith.constant 0 : index
      %14 = vector.load %arg5[%c0_12, %c0_13] : memref<1x32xf32, #tpu.memory_space<vmem>>, vector<1x32xf32>
      %15 = vector.broadcast %14 : vector<1x32xf32> to vector<16x32xf32>
      %16 = arith.addf %13, %15 : vector<16x32xf32>
      %17 = arith.truncf %16 : vector<16x32xf32> to vector<16x32xbf16>
      %c0_14 = arith.constant 0 : index
      %c0_15 = arith.constant 0 : index
      %18 = vector.load %arg6[%c0_14, %c0_15] : memref<16x32xbf16, #tpu.memory_space<vmem>>, vector<16x32xbf16>
      tpu.vector_store %arg6[%c0_14, %c0_15], %17 {strides = array<i32>} : memref<16x32xbf16, #tpu.memory_space<vmem>>, vector<16x32xbf16>,
    } else {
    }
    return
  }
  func.func @transform_0(%arg0: i32, %arg1: i32, %arg2: i32) -> (i32, i32) {
    %c0_i32 = arith.constant 0 : i32
    return %arg0, %arg2 : i32, i32
  }
  func.func @transform_1(%arg0: i32, %arg1: i32, %arg2: i32) -> (i32, i32) {
    %c0_i32 = arith.constant 0 : i32
    return %arg2, %arg1 : i32, i32
  }
  func.func @transform_2(%arg0: i32, %arg1: i32, %arg2: i32) -> (i32, i32) {
    %c0_i32 = arith.constant 0 : i32
    %c0_i32_0 = arith.constant 0 : i32
    return %c0_i32, %arg1 : i32, i32
  }
  func.func @transform_3(%arg0: i32, %arg1: i32, %arg2: i32) -> (i32, i32) {
    %c0_i32 = arith.constant 0 : i32
    return %arg0, %arg1 : i32, i32
  }
}

</mosaic_0001>

<bundles_post_ra>
// kernel: tpu_custom_call.1
= control target key start
LH: loop header
LB: loop body
LE: loop exit
PB: predicated region body
PF: predicated region fallthrough
CT: control target
= control target key end

     0   :  { %8 = vsyncpa [#allocation4], 0  ;;  %s283_s0 = inlined_call_operand.hbm [shape: f32[16,32], index: 0, kind: input, shape index: {}]   ;;  %s284_s1 = inlined_call_operand.hbm [shape: bf16[32,32], index: 1, kind: input, shape index: {}]   ;;  %s285_s2 = inlined_call_operand.vmem [shape: f32[1,32], index: 2, kind: input, shape index: {}]   ;;  %s286_s3 = inlined_call_operand.hbm [shape: bf16[16,32], index: 3, kind: output, shape index: {}]  }
   0x1   :  { %9 = vsyncpa [#allocation7], 0 }
   0x2   :  { %10 = vsyncpa [#allocation5], 0  ;;  %s15_s14 = sshll.u32 %s283_s0, 4  ;;  %s232_s15 = smov [#allocation3]   ;;  %s16_s14 = int_to_ptr.hbm [resolvable:$true] %s15_s14 }
   0x3   :  { %s17_s16 = sshll.u32 %s232_s15, 4  ;;  %s28_s19 = sshll.u32 %s284_s1, 4  ;;  %s18_s16 = int_to_ptr.vmem [resolvable:$true] %s17_s16  ;;  %s29_s19 = int_to_ptr.hbm [resolvable:$true] %s28_s19 }
   0x4   :  { %s233_s20 = smov 128   ;;  %s234_s21 = smov 8  }
   0x5   :  { %23 = dma.hbm_to_vmem [thread:$0]  %s16_s14, 256, %s18_s16, [#allocation4], %s233_s20, %s233_s20, %s234_s21  }
   0x6   :  { %s235_s22 = smov [#allocation6]   ;;  %s236_s24 = smov 64  }
   0x7   :  { %s30_s23 = sshll.u32 %s235_s22, 4  ;;  %s237_s25 = smov 4   ;;  %s31_s23 = int_to_ptr.vmem [resolvable:$true] %s30_s23 }
   0x8   :  { %36 = dma.hbm_to_vmem [thread:$0]  %s29_s19, 256, %s31_s23, [#allocation7], %s236_s24, %s236_s24, %s237_s25  }
   0x9   :  { %226 = dma.done.wait [#allocation4], 256  }
   0xa   :  { %227 = vsyncadd [#allocation4], 4294967040 }
   0xb   :  { %228 = dma.done.wait [#allocation7], 256  }
   0xc   :  { %229 = vsyncadd [#allocation7], 4294967040  ;;  %vm52_vm0 = vcmask 261120   ;;  %v238_v0 = vmov 0.0   ;;  %v144_v1 = vld [vmem:[#allocation6 + $0x8] sm:$0xff]  ;;  %v143_v2 = vld [vmem:[#allocation6] sm:$0xff] }
   0xd   :  { %53 = vst.msk [vmem:[#allocation2] sm:$0xff] %vm52_vm0, %v238_v0  ;;  %86 = vmatpush.bf16.msra.mxu0 %v144_v1  ;;  %v57_v3 = vld [vmem:[#allocation3] sm:$0xff]  ;;  %v58_v4 = vld [vmem:[#allocation3 + $0x8] sm:$0xff]  ;;  %v153_v10 = vld [vmem:[%s285_s2] ss:$0 sm:$0xff]  ;;  %vm111_vm1 = vcmask 257024  }
   0xe   :  { %54 = vst.msk [vmem:[#allocation2 + $0x8] sm:$0xff] %vm52_vm0, %v238_v0  ;;  %v59_v5 = vpack.c.bf16 %v58_v4, %v57_v3  ;;  %s239_s26 = smov [#allocation8]   ;;  %s120_s30 = sshll.u32 %s286_s3, 4  ;;  %s121_s30 = int_to_ptr.hbm [resolvable:$true] %s120_s30 }
   0xf   :  { %s118_s27 = sshll.u32 %s239_s26, 4  ;;  %s119_s27 = int_to_ptr.vmem [resolvable:$true] %s118_s27 }
  0x11   :  { %87 = vmatpush.bf16.msra.mxu0 %v143_v2 }
  0x14   :  { %142 = vmatmul.msk.bf16.vlgmr.msra.gmra.mxu0 %vm52_vm0, %v59_v5  ;;  %v55_v6 = vld [vmem:[#allocation2] sm:$0xff] }
  0x15   :  { %v56_v9 = vld [vmem:[#allocation2 + $0x8] sm:$0xff] }
  0x91   :  { %v89_v7 = vpop.f32.mrf.mxu0 }
  0x92   :  { %v94_v8 = vadd.f32 %v89_v7, %v55_v6 }
  0x94   :  { %96 = vst.msk [vmem:[#allocation2] sm:$0xff] %vm52_vm0, %v94_v8 }
  0x99   :  { %v91_v11 = vpop.f32.mrf.mxu0 }
  0x9a   :  { %v95_v12 = vadd.f32 %v91_v11, %v56_v9 }
  0x9b   :  { %v101_v13 = vld [vmem:[#allocation2] sm:$0xff] }
  0x9c   :  { %97 = vst.msk [vmem:[#allocation2 + $0x8] sm:$0xff] %vm52_vm0, %v95_v12  ;;  %v107_v14 = vadd.f32 %v153_v10, %v101_v13 }
  0x9e   :  { %v109_v15 = vpack.c.bf16 %v107_v14, %v107_v14 }
  0xa0   :  { %112 = vst.msk [vmem:[#allocation8] sm:$0xf] %vm111_vm1, %v109_v15 }
  0xa3   :  { %v102_v16 = vld [vmem:[#allocation2 + $0x8] sm:$0xff] }
  0xa4   :  { %v108_v17 = vadd.f32 %v153_v10, %v102_v16 }
  0xa6   :  { %v110_v18 = vpack.c.bf16 %v108_v17, %v108_v17 }
  0xa8   :  { %113 = vst.msk [vmem:[#allocation8 + $0x4] sm:$0xf] %vm111_vm1, %v110_v18 }
  0xa9   :  { %126 = dma.vmem_to_hbm [thread:$0]  %s119_s27, 128, %s121_s30, [#allocation5], %s236_s24, %s236_s24, %s237_s25  }
  0xaa   :  { %230 = dma.done.wait [#allocation5], 128  }
  0xab   :  { %231 = vsyncadd [#allocation5], 4294967168 }
  0xac   :  { %131 = vsyncpa [#allocation4], 1 }
  0xad   :  { %132 = vsyncpa [#allocation7], 1 }
  0xae   :  { %133 = vsyncpa [#allocation5], 1 }

</bundles_post_ra>
